<compile_context>
chip_gen: v7x
topology: tpu7x:2x2x1
jax: 0.10.0
libtpu: 0.0.40
codegen_flags: <defaults>
</compile_context>

<pallas_src>
import jax
import jax.numpy as jnp
from jax.experimental import pallas as pl
from jax.experimental.pallas import tpu as pltpu

_LANE = 128
_SUBLANE_ALIGN = 32               # covers f32 (8) / bf16 (16) / int8-fp8 (32) packing
_TARGET_BLOCK_BYTES = 2 * 1024 * 1024  # 2 MiB blocks: good on v5e/v6e/v7x


def _identity_kernel(r_ref, out_ref):
    # Pure pass-through of the relevance tile. HBM<->VMEM movement is handled
    # by the BlockSpec pipeline (double-buffered DMA); this is the VMEM copy.
    out_ref[...] = r_ref[...]


def _pick_row_tile(rows: int, cols: int, itemsize: int) -> int:
    """Row-tile size: ~2 MiB blocks, 32-sublane aligned, >=2 grid steps when possible."""
    if rows <= _SUBLANE_ALIGN:
        return rows                        # block == full dim -> always legal
    tb = _TARGET_BLOCK_BYTES // (cols * itemsize)
    tb = min(tb, rows)
    if tb * 2 > rows:
        # Ensure at least two grid steps so megacore (v7x, 2 TCs) has work to split.
        tb = pl.cdiv(rows, 2)
    tb = max(_SUBLANE_ALIGN, tb - (tb % _SUBLANE_ALIGN))
    return tb


def lrp_identity(a: jax.Array, r: jax.Array) -> jax.Array:
    """Relevance propagation through an identity layer: returns r unchanged.

    `a` is accepted for API parity with the PyTorch module but never touched,
    so it contributes no HBM traffic.
    """
    del a  # unused by the identity rule

    orig_shape = r.shape
    total = r.size

    # Lane-dense 2-D view.  Pad the flat length up to a multiple of 1024
    # (= 8 sublanes * 128 lanes) when needed so we always stay on the tiled,
    # pipelined fast path (never a single un-pipelined (1, N) block).
    flat = r.reshape(-1)
    pad = (-total) % (8 * _LANE)
    if pad:
        flat = jnp.pad(flat, (0, pad))
    rows = flat.size // _LANE
    r2 = flat.reshape(rows, _LANE)

    itemsize = r2.dtype.itemsize
    tb = _pick_row_tile(rows, _LANE, itemsize)
    grid = (pl.cdiv(rows, tb),)
    bytes_accessed = 2 * rows * _LANE * itemsize  # read r + write out

    out2 = pl.pallas_call(
        _identity_kernel,
        out_shape=jax.ShapeDtypeStruct((rows, _LANE), r2.dtype),
        grid=grid,
        in_specs=[pl.BlockSpec((tb, _LANE), lambda i: (i, 0))],
        out_specs=pl.BlockSpec((tb, _LANE), lambda i: (i, 0)),
        # Alias r -> output: no second HBM allocation when r is donatable.
        input_output_aliases={0: 0},
        compiler_params=pltpu.CompilerParams(
            dimension_semantics=("parallel",),
        ),
        cost_estimate=pl.CostEstimate(
            flops=0, transcendentals=0, bytes_accessed=bytes_accessed
        ),
    )(r2)

    out_flat = out2.reshape(-1)
    if pad:
        out_flat = out_flat[:total]
    return out_flat.reshape(orig_shape)


def lrp_identity_ref(a, r):
    """Pure-JAX reference (identical to the PyTorch module's forward)."""
    return r


if __name__ == "__main__":
    # Small shapes consistent with a conv-net LRP pipeline: (batch, C, H, W).
    B, C, H, W = 2, 4, 16, 16

    key = jax.random.PRNGKey(0)
    k_a, k_r = jax.random.split(key, 2)

    a = jax.random.uniform(k_a, (B, C, H, W), dtype=jnp.float32)
    r = jax.random.uniform(k_r, (B, C, H, W), dtype=jnp.float32)

    out = jax.block_until_ready(lrp_identity(a, r))
    ref = lrp_identity_ref(a, r)
    assert out.shape == r.shape
    assert out.dtype == r.dtype
    assert jnp.array_equal(out, ref), "identity pass-through mismatch"

    # Also exercise the padded (non-128-divisible) path.
    r_odd = jax.random.uniform(key, (2, 3, 5, 7), dtype=jnp.float32)
    out_odd = jax.block_until_ready(lrp_identity(r_odd, r_odd))
    assert jnp.array_equal(out_odd, r_odd), "padded-path pass-through mismatch"

    print("KERNEL_OK")
</pallas_src>

<mosaic_0001>
module attributes {stable_mosaic.version = 11 : i64} {
  func.func @_identity_kernel(%arg0: i32, %arg1: memref<16x128xf32, #tpu.memory_space<vmem>>, %arg2: memref<16x128xf32, #tpu.memory_space<vmem>>) attributes {dimension_semantics = [#tpu.dimension_semantics<parallel>], iteration_bounds = array<i64: 1>, scalar_prefetch = 0 : i64, scratch_operands = 0 : i64, tpu.core_type = #tpu.core_type<tc>, window_params = [{transform_indices = @transform_0, window_bounds = array<i64: 16, 128>}, {transform_indices = @transform_1, window_bounds = array<i64: 16, 128>}]} {
    %c0 = arith.constant 0 : index
    %c0_0 = arith.constant 0 : index
    %0 = vector.load %arg1[%c0, %c0_0] : memref<16x128xf32, #tpu.memory_space<vmem>>, vector<16x128xf32>
    %c0_1 = arith.constant 0 : index
    %c0_2 = arith.constant 0 : index
    %1 = vector.load %arg2[%c0_1, %c0_2] : memref<16x128xf32, #tpu.memory_space<vmem>>, vector<16x128xf32>
    tpu.vector_store %arg2[%c0_1, %c0_2], %0 {strides = array<i32>} : memref<16x128xf32, #tpu.memory_space<vmem>>, vector<16x128xf32>,
    return
  }
  func.func @transform_0(%arg0: i32) -> (i32, i32) {
    %c0_i32 = arith.constant 0 : i32
    %c0_i32_0 = arith.constant 0 : i32
    return %arg0, %c0_i32 : i32, i32
  }
  func.func @transform_1(%arg0: i32) -> (i32, i32) {
    %c0_i32 = arith.constant 0 : i32
    %c0_i32_0 = arith.constant 0 : i32
    return %arg0, %c0_i32 : i32, i32
  }
}

</mosaic_0001>

<bundles_post_ra>
// kernel: tpu_custom_call.1
= control target key start
LH: loop header
LB: loop body
LE: loop exit
PB: predicated region body
PF: predicated region fallthrough
CT: control target
= control target key end

     0   :  { %6 = vsyncpa [#allocation3], 0  ;;  %s134_s0 = inlined_call_operand.hbm [shape: f32[16,128], index: 0, kind: input, shape index: {}, may-alias: {0,1}]   ;;  %s135_s1 = inlined_call_operand.hbm [shape: f32[16,128], index: 1, kind: output, shape index: {}, may-alias: {0,1}]  }
   0x1   :  { %7 = vsyncpa [#allocation4], 0  ;;  %s96_s6 = smov [#allocation2]   ;;  %s48_s10 = scalar_lea.hbm %s134_s0, 256 }
   0x2   :  { %s13_s7 = sshll.u32 %s96_s6, 4  ;;  %p49_p0 = scmp.ne.s32.totalorder %s134_s0, %s48_s10  ;;  %s14_s7 = int_to_ptr.vmem [resolvable:$true] %s13_s7 }
   0x3   :  { %p52_p1 = scmp.lt.u32.totalorder %s48_s10, %s134_s0 }
   0x5   :  { %p54_p2 = pnand %p52_p1, %p49_p0 }
   0x7   :  { %57 = shalt.err (!%p54_p2)
}
   0x8   :  { %s58_s15 = scalar_lea.vmem %s14_s7, 256  ;;  %p63_p4 = scmp.lt.s32.totalorder %s14_s7, %s14_s7 }
   0x9   :  { %p59_p3 = scmp.ne.s32.totalorder %s14_s7, %s58_s15  ;;  %p64_p5 = scmp.lt.s32.totalorder %s58_s15, %s58_s15 }
   0xb   :  { %p65_p6 = por %p64_p5, %p63_p4 }
   0xd   :  { %p66_p7 = pnand %p65_p6, %p59_p3 }
   0xf   :  { %69 = shalt.err (!%p66_p7)
}
  0x10   :  { %s97_s16 = smov 128   ;;  %s98_s17 = smov 8  }
  0x11   :  { %19 = dma.hbm_to_vmem [thread:$0]  %s134_s0, 256, %s14_s7, [#allocation3], %s97_s16, %s97_s16, %s98_s17  }
  0x12   :  { %92 = dma.done.wait [#allocation3], 256  }
  0x13   :  { %93 = vsyncadd [#allocation3], 4294967040  ;;  %s99_s20 = smov [#allocation5]   ;;  %v23_v0 = vld [vmem:[#allocation2] sm:$0xff]  ;;  %v24_v1 = vld [vmem:[#allocation2 + $0x8] sm:$0xff] }
  0x14   :  { %s32_s21 = sshll.u32 %s99_s20, 4  ;;  %25 = vst [vmem:[#allocation5] sm:$0xff] %v23_v0  ;;  %26 = vst [vmem:[#allocation5 + $0x8] sm:$0xff] %v24_v1  ;;  %s33_s21 = int_to_ptr.vmem [resolvable:$true] %s32_s21 }
  0x15   :  { %s70_s22 = scalar_lea.vmem %s33_s21, 256  ;;  %p75_p9 = scmp.lt.s32.totalorder %s33_s21, %s33_s21 }
  0x16   :  { %p71_p8 = scmp.ne.s32.totalorder %s33_s21, %s70_s22  ;;  %p76_p10 = scmp.lt.s32.totalorder %s70_s22, %s70_s22 }
  0x18   :  { %p77_p11 = por %p76_p10, %p75_p9 }
  0x1a   :  { %p78_p12 = pnand %p77_p11, %p71_p8 }
  0x1c   :  { %81 = shalt.err (!%p78_p12)
}
  0x1d   :  { %s82_s0 = scalar_lea.hbm %s135_s1, 256 }
  0x1e   :  { %p83_p13 = scmp.ne.s32.totalorder %s135_s1, %s82_s0  ;;  %p86_p0 = scmp.lt.u32.totalorder %s82_s0, %s135_s1 }
  0x20   :  { %p88_p1 = pnand %p86_p0, %p83_p13 }
  0x22   :  { %91 = shalt.err (!%p88_p1)
}
  0x23   :  { %38 = dma.vmem_to_hbm [thread:$0]  %s33_s21, 256, %s135_s1, [#allocation4], %s97_s16, %s97_s16, %s98_s17  }
  0x24   :  { %94 = dma.done.wait [#allocation4], 256  }
  0x25   :  { %95 = vsyncadd [#allocation4], 4294967040 }
  0x26   :  { %42 = vsyncpa [#allocation3], 1 }
  0x27   :  { %43 = vsyncpa [#allocation4], 1 }

</bundles_post_ra>
